<compile_context>
chip_gen: v6e
topology: v6e:2x2x1
jax: 0.10.0
libtpu: 0.0.40
codegen_flags: <defaults>
</compile_context>

<pallas_src>
import functools

import jax
import jax.numpy as jnp
from jax import lax
from jax.experimental import pallas as pl
from jax.experimental.pallas import tpu as pltpu


def channel_gate_kernel(x_ref, w1t_ref, b1_ref, w2t_ref, b2_ref, o_ref, *, batch):
    # x_ref, o_ref: (TB, C, HW)
    # w1t_ref: (Ch, C)   b1_ref: (Ch, 1)   w2t_ref: (C, Ch)   b2_ref: (C, 1)
    tb = x_ref.shape[0]
    hw = x_ref.shape[2]
    inv_hw = 1.0 / hw

    def process(t):
        xt = x_ref[t]                                                    # (C, HW) native dtype
        # Global pools over the spatial (lane) axis; channels stay on sublanes.
        # The f32 cast feeds only the sum (f32 accumulation); max is exact in native dtype.
        avg = jnp.sum(xt.astype(jnp.float32), axis=1, keepdims=True) * inv_hw   # (C, 1)
        mx = jnp.max(xt, axis=1, keepdims=True).astype(jnp.float32)             # (C, 1)
        pooled = jnp.concatenate([avg, mx], axis=1)                      # (C, 2) col0=avg col1=max

        # Shared MLP: Linear(C -> Ch) -> ReLU -> Linear(Ch -> C), channels on sublanes.
        h = jnp.dot(w1t_ref[...], pooled, preferred_element_type=jnp.float32) + b1_ref[...]
        h = jnp.maximum(h, 0.0)                                          # (Ch, 2)
        att = jnp.dot(w2t_ref[...], h, preferred_element_type=jnp.float32) + b2_ref[...]  # (C, 2)

        # Sum over the two pool branches, sigmoid, then per-channel lane-broadcast scaling.
        scale = jax.nn.sigmoid(att[:, 0:1] + att[:, 1:2]).astype(o_ref.dtype)    # (C, 1)
        # Re-read x in the native dtype so no f32 copy of the slab stays live across the MLP.
        o_ref[t] = (x_ref[t] * scale).astype(o_ref.dtype)

    def body(t, carry):
        process(t)
        return carry

    if batch % tb == 0:
        if tb <= 4:
            # Short exact tile: static loop keeps the schedule fully visible to the LLO.
            for t in range(tb):
                process(t)
        else:
            lax.fori_loop(0, tb, body, 0)
    else:
        # cdiv grid: clamp to the valid rows of the (possibly partial) edge block.
        rows = jnp.minimum(tb, batch - pl.program_id(0) * tb)
        lax.fori_loop(0, rows, body, 0)


@functools.lru_cache(maxsize=None)
def _vmem_budget_bytes():
    """Generation-aware per-TensorCore VMEM budget used for block sizing."""
    kind = ""
    try:
        kind = jax.devices()[0].device_kind.lower()
    except Exception:
        pass
    cap = 0
    try:
        cap = int(getattr(pltpu.get_tpu_info(), "vmem_capacity_bytes", 0) or 0)
    except Exception:
        cap = 0
    v7_like = "7" in kind                          # v7x: only 64 MiB VMEM per TensorCore
    big_vmem = cap >= (120 << 20) or any(t in kind for t in ("v5e", "v5 lite", "v5p", "v6"))
    if big_vmem and not v7_like:
        return 96 << 20                            # v5e / v6e: 128 MiB physical VMEM
    return 48 << 20                                # v7x & unknown: leave compiler headroom


def _choose_batch_tile(B, C, HW, itemsize, vmem_budget):
    """Batches per grid step: as many as fit the VMEM budget (double-buffered in + out
    blocks), capped at ceil(B/2) so there are >= 2 grid steps whenever B >= 2 (keeps both
    v7x TensorCores busy on the 'parallel' batch axis)."""
    slab = max(1, C * HW * itemsize)
    per_batch = 4 * slab                                     # 2x input + 2x output buffering
    fixed = (8 << 20) + (4 * C * HW if itemsize < 4 else 0)  # weights / scratch / f32 slab temp
    usable = max(per_batch, vmem_budget - fixed)
    tb = max(1, min(B, usable // per_batch))
    half = -(-B // 2)                                        # ceil(B / 2)
    if B >= 2 and tb > half:
        tb = half
    return int(tb)


@jax.jit
def channel_gate(x, w1, b1, w2, b2):
    """x: (B, C, H, W).  w1: (C, Ch), b1: (Ch,), w2: (Ch, C), b2: (C,).
    (w1 = W1.T, w2 = W2.T of the PyTorch nn.Linear weights, so y = p @ w + b.)"""
    B, C, H, W = x.shape
    HW = H * W
    Ch = w1.shape[1]

    x_flat = x.reshape(B, C, HW)                   # free reshape, no data movement
    # Pre-transpose the tiny weights once in the wrapper so the kernel never transposes.
    w1t = w1.T.astype(jnp.float32)                 # (Ch, C)
    w2t = w2.T.astype(jnp.float32)                 # (C, Ch)
    b1c = b1.reshape(Ch, 1).astype(jnp.float32)
    b2c = b2.reshape(C, 1).astype(jnp.float32)

    itemsize = jnp.dtype(x.dtype).itemsize
    budget = _vmem_budget_bytes()
    tb = _choose_batch_tile(B, C, HW, itemsize, budget)
    grid = (pl.cdiv(B, tb),)

    # Explicit VMEM budget: double-buffered in + out blocks, (double-buffered) weights,
    # one worst-case f32 slab temporary for sub-f32 I/O, plus slack for compiler scratch.
    block_bytes = tb * C * HW * itemsize
    weight_bytes = 4 * (w1t.size + w2t.size + b1c.size + b2c.size)
    f32_slab = 4 * C * HW if itemsize < 4 else 0
    need = 4 * block_bytes + f32_slab + 2 * weight_bytes + (4 << 20)
    vmem_limit = int(min(max(need, 32 << 20), budget))

    kernel = functools.partial(channel_gate_kernel, batch=B)

    out_flat = pl.pallas_call(
        kernel,
        out_shape=jax.ShapeDtypeStruct((B, C, HW), x.dtype),
        grid_spec=pltpu.PrefetchScalarGridSpec(
            num_scalar_prefetch=0,
            grid=grid,
            in_specs=[
                pl.BlockSpec((tb, C, HW), lambda b: (b, 0, 0)),
                pl.BlockSpec((Ch, C), lambda b: (0, 0)),
                pl.BlockSpec((Ch, 1), lambda b: (0, 0)),
                pl.BlockSpec((C, Ch), lambda b: (0, 0)),
                pl.BlockSpec((C, 1), lambda b: (0, 0)),
            ],
            out_specs=pl.BlockSpec((tb, C, HW), lambda b: (b, 0, 0)),
        ),
        compiler_params=pltpu.CompilerParams(
            dimension_semantics=("parallel",),
            vmem_limit_bytes=vmem_limit,
        ),
    )(x_flat, w1t, b1c, w2t, b2c)

    return out_flat.reshape(B, C, H, W)


def channel_gate_reference(x, w1, b1, w2, b2):
    """Pure-JAX reference mirroring the PyTorch forward (pool_types=['avg','max'])."""
    B, C, H, W = x.shape
    xf = x.reshape(B, C, H * W)
    avg_pool = jnp.mean(xf, axis=2)          # (B, C)
    max_pool = jnp.max(xf, axis=2)           # (B, C)

    def mlp(p):
        h = jnp.maximum(p @ w1 + b1, 0.0)
        return h @ w2 + b2

    att = mlp(avg_pool) + mlp(max_pool)      # (B, C)
    scale = jax.nn.sigmoid(att)[:, :, None, None]
    return x * scale


def _run_case(B, C, H, W, reduction_ratio, seed):
    Ch = max(1, C // reduction_ratio)
    key = jax.random.PRNGKey(seed)
    kx, k1, k2, k3, k4 = jax.random.split(key, 5)

    x = jax.random.normal(kx, (B, C, H, W), dtype=jnp.float32)
    # PyTorch Linear: y = p @ W.T + b; we store the transposed weights directly:
    # w1 = W1.T (C, Ch), w2 = W2.T (Ch, C).
    w1 = jax.random.normal(k1, (C, Ch), dtype=jnp.float32) * 0.1
    b1 = jax.random.normal(k2, (Ch,), dtype=jnp.float32) * 0.1
    w2 = jax.random.normal(k3, (Ch, C), dtype=jnp.float32) * 0.1
    b2 = jax.random.normal(k4, (C,), dtype=jnp.float32) * 0.1

    out = jax.block_until_ready(channel_gate(x, w1, b1, w2, b2))
    ref = channel_gate_reference(x, w1, b1, w2, b2)
    assert out.shape == (B, C, H, W)
    assert jnp.allclose(out, ref, atol=1e-5, rtol=1e-5), (
        f"Pallas output mismatch vs reference for shape {(B, C, H, W)}")


if __name__ == "__main__":
    # Primary small case (even batch -> exact tiles, static inner loop path).
    _run_case(B=2, C=32, H=16, W=16, reduction_ratio=16, seed=0)
    # Odd batch -> cdiv grid with a partial edge block + dynamic-bound fori_loop path.
    _run_case(B=5, C=32, H=16, W=16, reduction_ratio=16, seed=0)
    print("KERNEL_OK")
</pallas_src>

<mosaic_0001>
module attributes {stable_mosaic.version = 11 : i64} {
  func.func @channel_gate_kernel(%arg0: i32, %arg1: memref<1x32x256xf32, #tpu.memory_space<vmem>>, %arg2: memref<2x32xf32, #tpu.memory_space<vmem>>, %arg3: memref<2x1xf32, #tpu.memory_space<vmem>>, %arg4: memref<32x2xf32, #tpu.memory_space<vmem>>, %arg5: memref<32x1xf32, #tpu.memory_space<vmem>>, %arg6: memref<1x32x256xf32, #tpu.memory_space<vmem>>) attributes {dimension_semantics = [#tpu.dimension_semantics<parallel>], iteration_bounds = array<i64: 2>, scalar_prefetch = 0 : i64, scratch_operands = 0 : i64, tpu.core_type = #tpu.core_type<tc>, window_params = [{transform_indices = @transform_0, window_bounds = array<i64: 1, 32, 256>}, {pipeline_mode = #tpu.pipeline_mode<synchronous>, transform_indices = @transform_1, window_bounds = array<i64: 2, 32>}, {pipeline_mode = #tpu.pipeline_mode<synchronous>, transform_indices = @transform_2, window_bounds = array<i64: 2, 1>}, {pipeline_mode = #tpu.pipeline_mode<synchronous>, transform_indices = @transform_3, window_bounds = array<i64: 32, 2>}, {pipeline_mode = #tpu.pipeline_mode<synchronous>, transform_indices = @transform_4, window_bounds = array<i64: 32, 1>}, {transform_indices = @transform_5, window_bounds = array<i64: 1, 32, 256>}]} {
    %c0 = arith.constant 0 : index
    %c0_0 = arith.constant 0 : index
    %c0_1 = arith.constant 0 : index
    %0 = vector.load %arg1[%c0, %c0_0, %c0_1] : memref<1x32x256xf32, #tpu.memory_space<vmem>>, vector<1x32x256xf32>
    %1 = vector.shape_cast %0 : vector<1x32x256xf32> to vector<32x256xf32>
    %cst = arith.constant dense<0.000000e+00> : vector<32xf32>
    %2 = vector.multi_reduction <add>, %1, %cst [1] : vector<32x256xf32> to vector<32xf32>
    %3 = vector.shape_cast %2 : vector<32xf32> to vector<32x1xf32>
    %cst_2 = arith.constant 3.906250e-03 : f32
    %4 = vector.broadcast %cst_2 : f32 to vector<32x1xf32>
    %5 = arith.mulf %3, %4 : vector<32x1xf32>
    %cst_3 = arith.constant dense<0xFF800000> : vector<32xf32>
    %6 = vector.multi_reduction <maximumf>, %1, %cst_3 [1] : vector<32x256xf32> to vector<32xf32>
    %7 = vector.shape_cast %6 : vector<32xf32> to vector<32x1xf32>
    %8 = tpu.concatenate %5, %7 in 1 : vector<32x1xf32>, vector<32x1xf32> -> vector<32x2xf32>
    %c0_4 = arith.constant 0 : index
    %c0_5 = arith.constant 0 : index
    %9 = vector.load %arg2[%c0_4, %c0_5] : memref<2x32xf32, #tpu.memory_space<vmem>>, vector<2x32xf32>
    %cst_6 = arith.constant dense<0.000000e+00> : vector<2x2xf32>
    %10 = tpu.matmul %9, %8, %cst_6 {dimension_numbers = #tpu.dot_dimension_numbers<[1], [0], [0], [1], [0, 0, 1, 1], [], []>} : vector<2x32xf32>, vector<32x2xf32>, vector<2x2xf32> -> vector<2x2xf32>
    %c0_7 = arith.constant 0 : index
    %c0_8 = arith.constant 0 : index
    %11 = vector.load %arg3[%c0_7, %c0_8] : memref<2x1xf32, #tpu.memory_space<vmem>>, vector<2x1xf32>
    %12 = vector.broadcast %11 : vector<2x1xf32> to vector<2x2xf32>
    %13 = arith.addf %10, %12 : vector<2x2xf32>
    %cst_9 = arith.constant 0.000000e+00 : f32
    %14 = vector.broadcast %cst_9 : f32 to vector<2x2xf32>
    %15 = arith.maximumf %13, %14 : vector<2x2xf32>
    %c0_10 = arith.constant 0 : index
    %c0_11 = arith.constant 0 : index
    %16 = vector.load %arg4[%c0_10, %c0_11] : memref<32x2xf32, #tpu.memory_space<vmem>>, vector<32x2xf32>
    %cst_12 = arith.constant dense<0.000000e+00> : vector<32x2xf32>
    %17 = tpu.matmul %16, %15, %cst_12 {dimension_numbers = #tpu.dot_dimension_numbers<[1], [0], [0], [1], [0, 0, 1, 1], [], []>} : vector<32x2xf32>, vector<2x2xf32>, vector<32x2xf32> -> vector<32x2xf32>
    %c0_13 = arith.constant 0 : index
    %c0_14 = arith.constant 0 : index
    %18 = vector.load %arg5[%c0_13, %c0_14] : memref<32x1xf32, #tpu.memory_space<vmem>>, vector<32x1xf32>
    %19 = vector.broadcast %18 : vector<32x1xf32> to vector<32x2xf32>
    %20 = arith.addf %17, %19 : vector<32x2xf32>
    %21 = vector.extract_strided_slice %20 {offsets = [0, 0], sizes = [32, 1], strides = [1, 1]} : vector<32x2xf32> to vector<32x1xf32>
    %22 = vector.extract_strided_slice %20 {offsets = [0, 1], sizes = [32, 1], strides = [1, 1]} : vector<32x2xf32> to vector<32x1xf32>
    %23 = arith.addf %21, %22 : vector<32x1xf32>
    %24 = arith.negf %23 : vector<32x1xf32>
    %25 = math.exp %24 : vector<32x1xf32>
    %cst_15 = arith.constant 1.000000e+00 : f32
    %26 = vector.broadcast %cst_15 : f32 to vector<32x1xf32>
    %27 = arith.addf %26, %25 : vector<32x1xf32>
    %28 = arith.divf %26, %27 : vector<32x1xf32>
    %c0_16 = arith.constant 0 : index
    %c0_17 = arith.constant 0 : index
    %c0_18 = arith.constant 0 : index
    %29 = vector.load %arg1[%c0_16, %c0_17, %c0_18] : memref<1x32x256xf32, #tpu.memory_space<vmem>>, vector<1x32x256xf32>
    %30 = vector.shape_cast %29 : vector<1x32x256xf32> to vector<32x256xf32>
    %31 = vector.broadcast %28 : vector<32x1xf32> to vector<32x256xf32>
    %32 = arith.mulf %30, %31 : vector<32x256xf32>
    %c0_19 = arith.constant 0 : index
    %c0_20 = arith.constant 0 : index
    %c0_21 = arith.constant 0 : index
    %33 = vector.load %arg6[%c0_19, %c0_20, %c0_21] : memref<1x32x256xf32, #tpu.memory_space<vmem>>, vector<1x32x256xf32>
    %34 = vector.shape_cast %33 : vector<1x32x256xf32> to vector<32x256xf32>
    %35 = vector.shape_cast %32 : vector<32x256xf32> to vector<1x32x256xf32>
    tpu.vector_store %arg6[%c0_19, %c0_20, %c0_21], %35 {strides = array<i32>} : memref<1x32x256xf32, #tpu.memory_space<vmem>>, vector<1x32x256xf32>,
    return
  }
  func.func @transform_0(%arg0: i32) -> (i32, i32, i32) {
    %c0_i32 = arith.constant 0 : i32
    %c0_i32_0 = arith.constant 0 : i32
    %c0_i32_1 = arith.constant 0 : i32
    return %arg0, %c0_i32, %c0_i32_0 : i32, i32, i32
  }
  func.func @transform_1(%arg0: i32) -> (i32, i32) {
    %c0_i32 = arith.constant 0 : i32
    %c0_i32_0 = arith.constant 0 : i32
    %c0_i32_1 = arith.constant 0 : i32
    return %c0_i32, %c0_i32_0 : i32, i32
  }
  func.func @transform_2(%arg0: i32) -> (i32, i32) {
    %c0_i32 = arith.constant 0 : i32
    %c0_i32_0 = arith.constant 0 : i32
    %c0_i32_1 = arith.constant 0 : i32
    return %c0_i32, %c0_i32_0 : i32, i32
  }
  func.func @transform_3(%arg0: i32) -> (i32, i32) {
    %c0_i32 = arith.constant 0 : i32
    %c0_i32_0 = arith.constant 0 : i32
    %c0_i32_1 = arith.constant 0 : i32
    return %c0_i32, %c0_i32_0 : i32, i32
  }
  func.func @transform_4(%arg0: i32) -> (i32, i32) {
    %c0_i32 = arith.constant 0 : i32
    %c0_i32_0 = arith.constant 0 : i32
    %c0_i32_1 = arith.constant 0 : i32
    return %c0_i32, %c0_i32_0 : i32, i32
  }
  func.func @transform_5(%arg0: i32) -> (i32, i32, i32) {
    %c0_i32 = arith.constant 0 : i32
    %c0_i32_0 = arith.constant 0 : i32
    %c0_i32_1 = arith.constant 0 : i32
    return %arg0, %c0_i32, %c0_i32_0 : i32, i32, i32
  }
}

</mosaic_0001>

<bundles_post_ra>
// kernel: channel_gate.1
= control target key start
LH: loop header
LB: loop body
LE: loop exit
PB: predicated region body
PF: predicated region fallthrough
CT: control target
= control target key end

     0   :  { %s737_s18 = smov 0   ;;  %s839_s0 = inlined_call_operand.vmem [shape: f32[2,32,256], index: 0, kind: input, shape index: {}]   ;;  %s840_s1 = inlined_call_operand.vmem [shape: f32[2,32], index: 1, kind: input, shape index: {}]   ;;  %s841_s2 = inlined_call_operand.vmem [shape: f32[2,1], index: 2, kind: input, shape index: {}]   ;;  %s842_s3 = inlined_call_operand.vmem [shape: f32[32,2], index: 3, kind: input, shape index: {}]   ;;  %s843_s4 = inlined_call_operand.vmem [shape: f32[32,1], index: 4, kind: input, shape index: {}]   ;;  %s844_s5 = inlined_call_operand.vmem [shape: f32[2,32,256], index: 5, kind: output, shape index: {}]  }
   0x1 LB: > { %s613_s19 = sadd.s32 4294967295, %s701_s18   ;;  %p617_p0 = scmp.ge.s32.totalorder %s701_s18, 1  ;;  %s701_s18 = sphi %s737_s18, %s15_s18  }
   0x2   : > { %p187_p1 = scmp.lt.s32.totalorder %s701_s18, 3 }
   0x4   : > { %p188_p2 = pnand %p617_p0, %p187_p1 }
   0x5   : > { %p215_p3 = scmp.lt.s32.totalorder (!%p188_p2), %s613_s19, 1  ;;  %s706_s22 = smov (!%p188_p2), 127  }
   0x6   : > { %191 = sbr.rel (%p188_p2) target bundleno = 853 (0x355), region = 40 }
   0xb   : > { %s846_s19 = smov (!%p215_p3, %s613_s19), 1  ;;  %v703_v16 = vmov 0.0   ;;  %vm704_vm0 = vmmov 0   ;;  %v705_v17 = vmov 0   ;;  %v267_v18 = vld [vmem:[%s841_s2] sm:$0x3] }
   0xc   : > { %s634_s20 = sshll.u32 %s846_s19, 6  ;;  %646 = vmatprep.subr.mxu0 %v703_v16  ;;  %654 = vmatprep.mubr.msk.f32.mxu0 %vm704_vm0, %v703_v16  ;;  %vm261_vm1 = vcmask 7168   ;;  %v266_v34 = vld [vmem:[%s840_s1] sm:$0x3]  ;;  %vm273_vm2 = vcmask 261120   ;;  %vm376_vm3 = vcmask 15360  }
   0xd   : > { %s219_s23 = scalar_lea.vmem %s839_s0, %s634_s20  ;;  %677 = vset.pattern.permute.xlu0 %v705_v17  ;;  %678 = vset.pattern.permute.xlu1 %v705_v17  ;;  %v348_v36 = vld [vmem:[%s842_s3] sm:$0xff]  ;;  %v353_v38 = vld [vmem:[%s843_s4 + $0x8] sm:$0xff]  ;;  %v354_v39 = vld [vmem:[%s843_s4 + $0x10] sm:$0xff]  ;;  %vm389_vm4 = vcmask 1041408   ;;  %s224_s25 = scalar_lea.vmem %s844_s5, %s634_s20 }
   0xe   : > { %v753_v0 = vld [vmem:[%s219_s23 + $0x30] sm:$0xff]  ;;  %v755_v1 = vld [vmem:[%s219_s23 + $0x38] sm:$0xff]  ;;  %v757_v2 = vld [vmem:[%s219_s23 + $0x20] sm:$0xff]  ;;  %659 = vmatprep.mubr.msk.f32.mxu1 %vm376_vm3, %v348_v36 }
   0xf   : > { %v258_v3 = vmax.f32 %v753_v0, %v755_v1  ;;  %v242_v4 = vadd.f32 %v755_v1, %v753_v0  ;;  %v763_v5 = vld [vmem:[%s219_s23 + $0x28] sm:$0xff]  ;;  %v765_v6 = vld [vmem:[%s219_s23 + $0x10] sm:$0xff]  ;;  %v767_v7 = vld [vmem:[%s219_s23 + $0x18] sm:$0xff] }
  0x10   : > { %v239_v8 = vadd.f32 %v763_v5, %v757_v2  ;;  %v236_v9 = vadd.f32 %v767_v7, %v765_v6  ;;  %v773_v10 = vld [vmem:[%s219_s23] sm:$0xff]  ;;  %v775_v11 = vld [vmem:[%s219_s23 + $0x8] sm:$0xff]  ;;  %v255_v12 = vmax.f32 %v757_v2, %v763_v5  ;;  %v252_v14 = vmax.f32 %v765_v6, %v767_v7  ;;  %v355_v40 = vld [vmem:[%s843_s4 + $0x18] sm:$0xff] }
  0x11   : > { %259 = vmax.xlane.f32.xlu1 %v258_v3  ;;  %243 = vadd.xlane.f32.xlu0 %v242_v4  ;;  %v233_v13 = vadd.f32 %v775_v11, %v773_v10  ;;  %v249_v15 = vmax.f32 %v773_v10, %v775_v11  ;;  %v352_v37 = vld [vmem:[%s843_s4] sm:$0xff]  ;;  %v349_v46 = vld [vmem:[%s842_s3 + $0x8] sm:$0xff]  ;;  %v350_v47 = vld [vmem:[%s842_s3 + $0x10] sm:$0xff] }
  0x12   : > { %v351_v48 = vld [vmem:[%s842_s3 + $0x18] sm:$0xff] }
  0x15   : > { %240 = vadd.xlane.f32.xlu0 %v239_v8  ;;  %237 = vadd.xlane.f32.xlu1 %v236_v9 }
  0x19   : > { %256 = vmax.xlane.f32.xlu0 %v255_v12  ;;  %234 = vadd.xlane.f32.xlu1 %v233_v13 }
  0x1d   : > { %253 = vmax.xlane.f32.xlu0 %v252_v14  ;;  %250 = vmax.xlane.f32.xlu1 %v249_v15 }
  0x2e   : > { %358 = vperm.xlu1 %678, %v352_v37  }
  0x32   : > { %363 = vperm.xlu1 %678, %v353_v38  }
  0x33   : > { %270 = vperm.xlu0 %677, %v267_v18  }
  0x36   : > { %368 = vperm.xlu1 %678, %v354_v39  }
  0x3a   : > { %373 = vperm.xlu1 %678, %v355_v40  }
  0x9a   : > { %v260_v19 = vpop.xlane.xlu1 %259  ;;  %v244_v20 = vpop.xlane.xlu0 %243 }
  0x9b   : > { %v248_v21 = vmul.f32 0.00390625, %v244_v20 }
  0x9d   : > { %v265_v22 = vsel %vm261_vm1, %v248_v21, %v260_v19 }
  0x9e   : > { %647 = vmatpush3.msra.mxu0 %v265_v22  ;;  %v241_v23 = vpop.xlane.xlu0 %240  ;;  %v238_v24 = vpop.xlane.xlu1 %237 }
  0x9f   : > { %648 = vmatprep.subr.mxu0 %v703_v16  ;;  %v247_v25 = vmul.f32 0.00390625, %v241_v23  ;;  %v246_v29 = vmul.f32 0.00390625, %v238_v24 }
  0xa2   : > { %v257_v26 = vpop.xlane.xlu0 %256  ;;  %v235_v27 = vpop.xlane.xlu1 %234 }
  0xa3   : > { %v264_v28 = vsel %vm261_vm1, %v247_v25, %v257_v26  ;;  %v245_v30 = vmul.f32 0.00390625, %v235_v27 }
  0xa4   : > { %649 = vmatpush3.msra.mxu0 %v264_v28 }
  0xa5   : > { %650 = vmatprep.subr.mxu0 %v703_v16 }
  0xa6   : > { %v254_v31 = vpop.xlane.xlu0 %253  ;;  %v251_v32 = vpop.xlane.xlu1 %250 }
  0xa7   : > { %v263_v33 = vsel %vm261_vm1, %v246_v29, %v254_v31  ;;  %v262_v35 = vsel %vm261_vm1, %v245_v30, %v251_v32 }
  0xa8   : > { %651 = vmatpush3.msra.mxu0 %v263_v33 }
  0xa9   : > { %652 = vmatprep.subr.mxu0 %v703_v16 }
  0xaa   : > { %653 = vmatpush3.msra.mxu0 %v262_v35  ;;  %v359_v49 = vpop.permute.xlu1 %358 }
  0xab   : > { %655 = vmatmul.mubr.msk.f32.vlgmr.msra.gmra.mxu0 %vm273_vm2, %v266_v34 }
  0xae   : > { %v271_v41 = vpop.permute.xlu0 %270  ;;  %v364_v50 = vpop.permute.xlu1 %363 }
  0xb2   : > { %v369_v56 = vpop.permute.xlu1 %368 }
  0xb6   : > { %v374_v59 = vpop.permute.xlu1 %373 }
 0x16b   : > { %v343_v42 = vpop.f32.mrf.mxu0 }
 0x16c   : > { %v344_v43 = vadd.f32 %v343_v42, %v271_v41 }
 0x16d   : > { %v656_v44 = vpop.f32.mrf.mxu0 }
 0x16e   : > { %v347_v45 = vmax.f32 %v344_v43, 0.0 }
 0x170   : > { %657 = vmatprep.subr.msk.mxu1 %vm389_vm4, %v347_v45 }
 0x171   : > { %658 = vmatpush3.msk.msra.mxu1 %vm389_vm4, %v347_v45 }
 0x172   : > { %660 = vmatmul.mubr.msk.f32.vlgmr.msra.gmra.mxu1 %vm376_vm3, %v349_v46 }
 0x173   : > { %662 = vmatprep.mubr.msk.f32.mxu1 %vm376_vm3, %v350_v47 }
 0x176   : > { %663 = vmatmul.mubr.msk.f32.gmra.mxu1 %vm376_vm3, %v351_v48 }
 0x232   : > { %v661_v51 = vpop.f32.mrf.mxu1 }
 0x233   : > { %v465_v52 = vadd.f32 %v661_v51, %v364_v50 }
 0x234   : > { %v459_v53 = vpop.f32.mrf.mxu1 }
 0x235   : > { %484 = vrot.lane.b32.xlu1 %v465_v52, %s706_s22  ;;  %v460_v55 = vadd.f32 %v459_v53, %v359_v49 }
 0x236   : > { %v664_v54 = vpop.f32.mrf.mxu1 }
 0x237   : > { %v475_v60 = vadd.f32 %v664_v54, %v374_v59 }
 0x238   : > { %v469_v57 = vpop.f32.mrf.mxu1 }
 0x239   : > { %482 = vrot.lane.b32.xlu1 %v460_v55, %s706_s22  ;;  %v470_v58 = vadd.f32 %v469_v57, %v369_v56 }
 0x23d   : > { %486 = vrot.lane.b32.xlu1 %v470_v58, %s706_s22 }
 0x241   : > { %488 = vrot.lane.b32.xlu1 %v475_v60, %s706_s22 }
 0x2a7   : > { %v485_v61 = vpop.permute.xlu1 %484 }
 0x2a8   : > { %v495_v62 = vadd.f32 %v485_v61, %v465_v52 }
 0x2aa   : > { %v629_v63 = vmul.f32 -1.442695, %v495_v62 }
 0x2ab   : > { %v483_v3 = vpop.permute.xlu1 %482 }
 0x2ac   : > { %679 = vpow2.f32 %v629_v63  ;;  %v494_v4 = vadd.f32 %v483_v3, %v460_v55 }
 0x2ae   : > { %v628_v8 = vmul.f32 -1.442695, %v494_v4 }
 0x2af   : > { %v487_v9 = vpop.permute.xlu1 %486 }
 0x2b0   : > { %681 = vpow2.f32 %v628_v8  ;;  %v496_v12 = vadd.f32 %v487_v9, %v470_v58 }
 0x2b2   : > { %v630_v13 = vmul.f32 -1.442695, %v496_v12 }
 0x2b3   : > { %v489_v14 = vpop.permute.xlu1 %488 }
 0x2b4   : > { %683 = vpow2.f32 %v630_v13  ;;  %v497_v15 = vadd.f32 %v489_v14, %v475_v60 }
 0x2b6   : > { %v631_v16 = vmul.f32 -1.442695, %v497_v15 }
 0x2b8   : > { %685 = vpow2.f32 %v631_v16 }
 0x2b9   : > { %v680_v17 = vpop.eup %679 }
 0x2ba   : > { %v511_v18 = vadd.f32 1.0, %v680_v17 }
 0x2bc   : > { %687 = vrcp.f32 %v511_v18 }
 0x2bd   : > { %v682_v19 = vpop.eup %681 }
 0x2be   : > { %v510_v20 = vadd.f32 1.0, %v682_v19 }
 0x2c0   : > { %689 = vrcp.f32 %v510_v20 }
 0x2c1   : > { %v684_v21 = vpop.eup %683 }
 0x2c2   : > { %v512_v22 = vadd.f32 1.0, %v684_v21 }
 0x2c4   : > { %691 = vrcp.f32 %v512_v22 }
 0x2c5   : > { %v686_v23 = vpop.eup %685 }
 0x2c6   : > { %v513_v24 = vadd.f32 1.0, %v686_v23 }
 0x2c8   : > { %693 = vrcp.f32 %v513_v24 }
 0x2c9   : > { %v688_v25 = vpop.eup %687 }
 0x2ca   : > { %529 = vperm.xlu1 %678, %v688_v25  }
 0x2cd   : > { %v690_v26 = vpop.eup %689 }
 0x2ce   : > { %524 = vperm.xlu0 %677, %v690_v26  }
 0x2d1   : > { %v692_v27 = vpop.eup %691 }
 0x2d2   : > { %534 = vperm.xlu0 %677, %v692_v27  }
 0x2d5   : > { %v694_v28 = vpop.eup %693 }
 0x2d6   : > { %539 = vperm.xlu1 %678, %v694_v28  }
 0x345   : > { %v530_v29 = vpop.permute.xlu1 %529 }
 0x346   : > { %v544_v30 = vmul.f32 %v530_v29, %v765_v6  ;;  %v545_v31 = vmul.f32 %v530_v29, %v767_v7 }
 0x348   : > { %552 = vst [vmem:[%s224_s25 + $0x10] sm:$0xff] %v544_v30  ;;  %553 = vst [vmem:[%s224_s25 + $0x18] sm:$0xff] %v545_v31 }
 0x349   : > { %v525_v32 = vpop.permute.xlu0 %524 }
 0x34a   : > { %v542_v33 = vmul.f32 %v525_v32, %v773_v10  ;;  %v543_v34 = vmul.f32 %v525_v32, %v775_v11 }
 0x34c   : > { %550 = vst [vmem:[%s224_s25] sm:$0xff] %v542_v33  ;;  %551 = vst [vmem:[%s224_s25 + $0x8] sm:$0xff] %v543_v34 }
 0x34d   : > { %v535_v35 = vpop.permute.xlu0 %534 }
 0x34e   : > { %v546_v36 = vmul.f32 %v535_v35, %v757_v2  ;;  %v547_v37 = vmul.f32 %v535_v35, %v763_v5 }
 0x350   : > { %554 = vst [vmem:[%s224_s25 + $0x20] sm:$0xff] %v546_v36  ;;  %555 = vst [vmem:[%s224_s25 + $0x28] sm:$0xff] %v547_v37 }
 0x351   : > { %v540_v38 = vpop.permute.xlu1 %539 }
 0x352   : > { %v548_v6 = vmul.f32 %v540_v38, %v753_v0  ;;  %v549_v7 = vmul.f32 %v540_v38, %v755_v1 }
 0x354   : > { %556 = vst [vmem:[%s224_s25 + $0x30] sm:$0xff] %v548_v6  ;;  %557 = vst [vmem:[%s224_s25 + $0x38] sm:$0xff] %v549_v7 }
 0x355 PF: > { %s15_s18 = sadd.s32 1, %s701_s18  }
 0x356   : > { %p12_p4 = scmp.ge.s32.totalorder %s15_s18, 4  }
 0x358   :  { %14 = sbr.rel (!%p12_p4) target bundleno = 1 (0x1), region = 70 }

</bundles_post_ra>
